<compile_context>
chip_gen: v7x
topology: tpu7x:2x2x1
jax: 0.10.0
libtpu: 0.0.40
codegen_flags: <defaults>
</compile_context>

<pallas_src>
import jax
import jax.numpy as jnp
from jax.experimental import pallas as pl
from jax.experimental.pallas import tpu as pltpu


def _mmoe_lora_a_fused_kernel(x_ref, w_ref, o_ref):
    # x_ref: (B_tile, D_in)   current batch tile
    # w_ref: (D_in, E*r)      fused, pre-transposed weight (resident, constant block)
    # o_ref: (B_tile, E*r)    lane-dense fused output tile
    o_ref[...] = jnp.dot(
        x_ref[...], w_ref[...], preferred_element_type=jnp.float32
    ).astype(o_ref.dtype)


def mmoe_linear_a(x, weights, *, max_b_tile=512):
    """Pallas implementation of MMOELinearA.forward.

    Args:
      x:       [B, D_in] input.
      weights: [E, r, D_in] stacked expert weights (nn.Linear [out, in] layout).

    Returns:
      list of E arrays, each [B, r] (matches the PyTorch module's list output).
    """
    B, D_in = x.shape
    E, r, D_in_w = weights.shape
    assert D_in == D_in_w
    N = E * r

    # Fuse experts: W_flat[:, e*r + j] = weights[e, j, :], so
    #   y = x @ W_flat  and  y[:, e*r:(e+1)*r] == x @ weights[e].T
    # Transpose happens once in the wrapper (layout plumbing), never in-kernel.
    w_flat = jnp.transpose(weights.reshape(N, D_in))  # (D_in, N)

    # Batch tiling: one "parallel" grid axis over B. Tile is either the full B
    # (small batches; block == full dim is always legal) or a multiple of 8
    # capped for VMEM (x, out double-buffered + resident weight stay well under
    # the 32 MiB default scoped VMEM, so this also fits v7x's 64 MiB physical).
    if B <= max_b_tile:
        b_tile = B
    else:
        b_tile = max_b_tile  # multiple of 8 by construction (512)
    grid_b = pl.cdiv(B, b_tile)
    b_pad = grid_b * b_tile

    x_in = x
    if b_pad != B:
        x_in = jnp.pad(x, ((0, b_pad - B), (0, 0)))

    out = pl.pallas_call(
        _mmoe_lora_a_fused_kernel,
        out_shape=jax.ShapeDtypeStruct((b_pad, N), x.dtype),
        grid_spec=pltpu.PrefetchScalarGridSpec(
            num_scalar_prefetch=0,
            grid=(grid_b,),
            in_specs=[
                # one batch tile of x per grid step
                pl.BlockSpec((b_tile, D_in), lambda i: (i, 0)),
                # tiny fused weight: constant block index -> fetched once, resident
                pl.BlockSpec((D_in, N), lambda i: (0, 0)),
            ],
            out_specs=pl.BlockSpec((b_tile, N), lambda i: (i, 0)),
        ),
        compiler_params=pltpu.CompilerParams(
            dimension_semantics=("parallel",),
        ),
    )(x_in, w_flat)

    if b_pad != B:
        out = out[:B]

    # PyTorch forward returns a Python list of per-expert outputs.
    return [out[:, e * r:(e + 1) * r] for e in range(E)]


def _reference(x, weights):
    # pure-JAX reference: y_i = x @ W_i^T
    return [x @ weights[e].T for e in range(weights.shape[0])]


if __name__ == "__main__":
    # Module config (small, consistent with MMOELinearA __init__):
    in_features = 32
    out_features = 16
    expert_num = 4
    assert out_features % expert_num == 0
    r = out_features // expert_num  # 4

    batch = 8

    key = jax.random.PRNGKey(0)
    kx, kw = jax.random.split(key)

    # Deterministic synthetic parameters (shape matches nn.Linear(in, r).weight
    # per expert, stacked over experts).
    x = jax.random.normal(kx, (batch, in_features), dtype=jnp.float32)
    weights = (
        jax.random.normal(kw, (expert_num, r, in_features), dtype=jnp.float32)
        * 0.1
    )

    outs = mmoe_linear_a(x, weights)
    outs = [jax.block_until_ready(o) for o in outs]

    refs = _reference(x, weights)
    for o, ref in zip(outs, refs):
        assert o.shape == (batch, r)
        assert jnp.allclose(o, ref, atol=1e-5, rtol=1e-5)

    print("KERNEL_OK")
</pallas_src>

<mosaic_0001>
module attributes {stable_mosaic.version = 11 : i64} {
  func.func @_mmoe_lora_a_fused_kernel(%arg0: i32, %arg1: memref<8x32xf32, #tpu.memory_space<vmem>>, %arg2: memref<32x16xf32, #tpu.memory_space<vmem>>, %arg3: memref<8x16xf32, #tpu.memory_space<vmem>>) attributes {dimension_semantics = [#tpu.dimension_semantics<parallel>], iteration_bounds = array<i64: 1>, scalar_prefetch = 0 : i64, scratch_operands = 0 : i64, tpu.core_type = #tpu.core_type<tc>, window_params = [{transform_indices = @transform_0, window_bounds = array<i64: 8, 32>}, {pipeline_mode = #tpu.pipeline_mode<synchronous>, transform_indices = @transform_1, window_bounds = array<i64: 32, 16>}, {transform_indices = @transform_2, window_bounds = array<i64: 8, 16>}]} {
    %c0 = arith.constant 0 : index
    %c0_0 = arith.constant 0 : index
    %0 = vector.load %arg1[%c0, %c0_0] : memref<8x32xf32, #tpu.memory_space<vmem>>, vector<8x32xf32>
    %c0_1 = arith.constant 0 : index
    %c0_2 = arith.constant 0 : index
    %1 = vector.load %arg2[%c0_1, %c0_2] : memref<32x16xf32, #tpu.memory_space<vmem>>, vector<32x16xf32>
    %cst = arith.constant dense<0.000000e+00> : vector<8x16xf32>
    %2 = tpu.matmul %0, %1, %cst {dimension_numbers = #tpu.dot_dimension_numbers<[1], [0], [0], [1], [0, 0, 1, 1], [], []>} : vector<8x32xf32>, vector<32x16xf32>, vector<8x16xf32> -> vector<8x16xf32>
    %c0_3 = arith.constant 0 : index
    %c0_4 = arith.constant 0 : index
    %3 = vector.load %arg3[%c0_3, %c0_4] : memref<8x16xf32, #tpu.memory_space<vmem>>, vector<8x16xf32>
    tpu.vector_store %arg3[%c0_3, %c0_4], %2 {strides = array<i32>} : memref<8x16xf32, #tpu.memory_space<vmem>>, vector<8x16xf32>,
    return
  }
  func.func @transform_0(%arg0: i32) -> (i32, i32) {
    %c0_i32 = arith.constant 0 : i32
    %c0_i32_0 = arith.constant 0 : i32
    return %arg0, %c0_i32 : i32, i32
  }
  func.func @transform_1(%arg0: i32) -> (i32, i32) {
    %c0_i32 = arith.constant 0 : i32
    %c0_i32_0 = arith.constant 0 : i32
    %c0_i32_1 = arith.constant 0 : i32
    return %c0_i32, %c0_i32_0 : i32, i32
  }
  func.func @transform_2(%arg0: i32) -> (i32, i32) {
    %c0_i32 = arith.constant 0 : i32
    %c0_i32_0 = arith.constant 0 : i32
    return %arg0, %c0_i32 : i32, i32
  }
}

</mosaic_0001>

<bundles_post_ra>
// kernel: tpu_custom_call.1
= control target key start
LH: loop header
LB: loop body
LE: loop exit
PB: predicated region body
PF: predicated region fallthrough
CT: control target
= control target key end

     0   :  { %v158_v3 = vmov 0.0|0.0   ;;  %vm159_vm0 = vmmov 0   ;;  %v160_v6 = vmov 0.0   ;;  %s204_s0 = inlined_call_operand.vmem [shape: f32[8,32], index: 0, kind: input, shape index: {}]   ;;  %s205_s1 = inlined_call_operand.vmem [shape: f32[32,16], index: 1, kind: input, shape index: {}]   ;;  %s206_s2 = inlined_call_operand.hbm [shape: f32[8,16], index: 2, kind: output, shape index: {}]  }
   0x1   :  { %v13_v0 = vld [vmem:[%s205_s1] sm:$0xff]  ;;  %v14_v1 = vld [vmem:[%s205_s1 + $0x8] sm:$0xff]  ;;  %v15_v2 = vld [vmem:[%s205_s1 + $0x10] sm:$0xff]  ;;  %124 = vmatprep.subr.bf16.mxu0 %v158_v3  ;;  %121 = vmatprep.mubr.msk.f32.mxu0 %vm159_vm0, %v160_v6 }
   0x2   :  { %v125_v4 = vpack.c.bf16 %v14_v1, %v13_v0  ;;  %v16_v5 = vld [vmem:[%s205_s1 + $0x18] sm:$0xff] }
   0x3   :  { %7 = vsyncpa [#allocation3], 0  ;;  %v128_v7 = vpack.c.bf16 %v16_v5, %v15_v2  ;;  %v12_v8 = vld [vmem:[%s204_s0] sm:$0xff]  ;;  %vm17_vm1 = vcmask 261120   ;;  %s161_s19 = smov [#allocation2]   ;;  %vm91_vm2 = vcmask 130048  }
   0x4   :  { %126 = vmatpush3.bf16.msra.mxu0 %v125_v4  ;;  %s99_s20 = sshll.u32 %s161_s19, 4  ;;  %s100_s20 = int_to_ptr.vmem [resolvable:$true] %s99_s20 }
   0x5   :  { %127 = vmatprep.subr.bf16.mxu0 %v158_v3  ;;  %s134_s1 = scalar_lea.vmem %s100_s20, 128  ;;  %p139_p1 = scmp.lt.s32.totalorder %s100_s20, %s100_s20 }
   0x6   :  { %p135_p0 = scmp.ne.s32.totalorder %s100_s20, %s134_s1  ;;  %p140_p2 = scmp.lt.s32.totalorder %s134_s1, %s134_s1 }
   0x8   :  { %129 = vmatpush3.bf16.msra.mxu0 %v128_v7  ;;  %p141_p3 = por %p140_p2, %p139_p1 }
   0xa   :  { %p142_p4 = pnand %p141_p3, %p135_p0 }
   0xb   :  { %122 = vmatmul.mubr.msk.f32.vlgmr.msra.gmra.mrb[0].mxu0 %vm17_vm1, %v12_v8 }
  0xde   :  { %v87_v9 = vpop.f32.mrb[0].mxu0 }
  0xdf   :  { %92 = vst.msk [vmem:[#allocation2] sm:$0xff] %vm91_vm2, %v87_v9  ;;  %v123_v10 = vpop.f32.mrb[1].mxu0 }
  0xe0   :  { %145 = shalt.err (!%p142_p4)
}
  0xe1   :  { %s146_s0 = scalar_lea.hbm %s206_s2, 128 }
  0xe2   :  { %p147_p5 = scmp.ne.s32.totalorder %s206_s2, %s146_s0  ;;  %p150_p6 = scmp.lt.u32.totalorder %s146_s0, %s206_s2 }
  0xe4   :  { %p152_p7 = pnand %p150_p6, %p147_p5 }
  0xe6   :  { %155 = shalt.err (!%p152_p7)
}
  0xe7   :  { %102 = dma.vmem_to_hbm [thread:$0]  %s100_s20, 128, %s206_s2, [#allocation3]  }
  0xe8   :  { %156 = dma.done.wait [#allocation3], 128  }
  0xe9   :  { %157 = vsyncadd [#allocation3], 4294967168 }
  0xea   :  { %106 = vsyncpa [#allocation3], 1 }

</bundles_post_ra>
